<compile_context>
chip_gen: v6e
topology: v6e:2x2x1
jax: 0.10.0
libtpu: 0.0.40
codegen_flags: <defaults>
</compile_context>

<pallas_src>
import functools

import jax
import jax.numpy as jnp
import numpy as np
from jax.experimental import pallas as pl
from jax.experimental.pallas import tpu as pltpu


def _addnorm_kernel(*refs, dropout_p: float, eps: float, use_dropout: bool):
    if use_dropout:
        x_ref, y_ref, bits_ref, gamma_ref, beta_ref, o_ref = refs
    else:
        x_ref, y_ref, gamma_ref, beta_ref, o_ref = refs

    x = x_ref[...].astype(jnp.float32)          # (TM, D)
    y = y_ref[...].astype(jnp.float32)          # (TM, D)

    if use_dropout:
        # Integer-domain keep test: keep with probability ~ (1 - p).
        thresh = jnp.uint32(min(int(round(dropout_p * 2.0 ** 32)), 2 ** 32 - 1))
        keep = bits_ref[...] >= thresh
        y = jnp.where(keep, y * jnp.float32(1.0 / (1.0 - dropout_p)),
                      jnp.zeros_like(y))

    z = x + y                                   # residual add
    mean = jnp.mean(z, axis=-1, keepdims=True)
    ctr = z - mean
    var = jnp.mean(ctr * ctr, axis=-1, keepdims=True)
    inv = jax.lax.rsqrt(var + jnp.float32(eps))
    out = ctr * inv * gamma_ref[...].astype(jnp.float32) \
        + beta_ref[...].astype(jnp.float32)
    o_ref[...] = out.astype(o_ref.dtype)


def _pick_row_tile(n_rows: int, d: int, *, itemsize: int = 4,
                   n_bufs: int = 8, vmem_budget: int = 24 << 20) -> int:
    """Largest power-of-two row tile (multiple of 8 sublanes) that divides
    n_rows and keeps ~n_bufs double-buffered (TM, D) f32/u32 tiles under a
    conservative VMEM budget; falls back to the full array."""
    for tm in (2048, 1024, 512, 256, 128, 64, 32, 16, 8):
        if n_rows % tm == 0 and tm * d * itemsize * n_bufs <= vmem_budget:
            return tm
    return n_rows


def add_norm(x, y, gamma, beta, *, dropout_p: float = 0.1,
             training: bool = False, eps: float = 1e-5, rng_key=None):
    """x, y: (..., D);  gamma, beta: (D,).  Returns LayerNorm(x + Dropout(y))."""
    assert x.shape == y.shape
    D = x.shape[-1]
    lead = x.shape[:-1]
    N = int(np.prod(lead)) if lead else 1

    x2 = x.reshape(N, D)
    y2 = y.reshape(N, D)
    gamma2 = gamma.reshape(1, D)
    beta2 = beta.reshape(1, D)

    use_dropout = bool(training) and float(dropout_p) > 0.0
    tm = _pick_row_tile(N, D)
    grid = (N // tm,)

    row_spec = pl.BlockSpec((tm, D), lambda i: (i, 0))
    vec_spec = pl.BlockSpec((1, D), lambda i: (0, 0))

    inputs = [x2, y2]
    in_specs = [row_spec, row_spec]
    if use_dropout:
        if rng_key is None:
            rng_key = jax.random.PRNGKey(0)
        bits = jax.random.bits(rng_key, (N, D), dtype=jnp.uint32)
        inputs.append(bits)
        in_specs.append(row_spec)
    inputs += [gamma2, beta2]
    in_specs += [vec_spec, vec_spec]

    kernel = functools.partial(_addnorm_kernel,
                               dropout_p=float(dropout_p),
                               eps=float(eps),
                               use_dropout=use_dropout)

    out2 = pl.pallas_call(
        kernel,
        out_shape=jax.ShapeDtypeStruct((N, D), x.dtype),
        grid_spec=pltpu.PrefetchScalarGridSpec(
            num_scalar_prefetch=0,
            grid=grid,
            in_specs=in_specs,
            out_specs=row_spec,
        ),
        compiler_params=pltpu.CompilerParams(
            dimension_semantics=("parallel",),      # independent row tiles
            vmem_limit_bytes=32 * 1024 * 1024,      # raises v5e's 16 MiB default
        ),
    )(*inputs)
    return out2.reshape(x.shape)


if __name__ == "__main__":
    # Small, module-consistent shapes: batch=2, seq=8, embedding_dim=128.
    B, S, D = 2, 8, 128
    P = 0.1
    EPS = 1e-5

    key = jax.random.PRNGKey(0)
    kx, ky, kg, kb, kd = jax.random.split(key, 5)
    x = jax.random.normal(kx, (B, S, D), dtype=jnp.float32)
    y = jax.random.normal(ky, (B, S, D), dtype=jnp.float32)
    gamma = 1.0 + 0.1 * jax.random.normal(kg, (D,), dtype=jnp.float32)
    beta = 0.05 * jax.random.normal(kb, (D,), dtype=jnp.float32)

    def ref_layernorm(z):
        mean = jnp.mean(z, axis=-1, keepdims=True)
        var = jnp.mean((z - mean) ** 2, axis=-1, keepdims=True)
        return (z - mean) * jax.lax.rsqrt(var + EPS) * gamma + beta

    # Eval mode: dropout is identity -> LayerNorm(x + y).
    out_eval = jax.block_until_ready(
        add_norm(x, y, gamma, beta, dropout_p=P, training=False, eps=EPS))
    ref_eval = ref_layernorm(x + y)
    np.testing.assert_allclose(np.asarray(out_eval), np.asarray(ref_eval),
                               rtol=1e-5, atol=1e-5)

    # Training mode: replicate the wrapper's mask in pure JAX and compare.
    out_train = jax.block_until_ready(
        add_norm(x, y, gamma, beta, dropout_p=P, training=True, eps=EPS,
                 rng_key=kd))
    bits = jax.random.bits(kd, (B * S, D), dtype=jnp.uint32).reshape(B, S, D)
    thresh = jnp.uint32(min(int(round(P * 2.0 ** 32)), 2 ** 32 - 1))
    y_drop = jnp.where(bits >= thresh, y / (1.0 - P), jnp.zeros_like(y))
    ref_train = ref_layernorm(x + y_drop)
    np.testing.assert_allclose(np.asarray(out_train), np.asarray(ref_train),
                               rtol=1e-5, atol=1e-5)

    print("KERNEL_OK")
</pallas_src>

<mosaic_0001>
module attributes {stable_mosaic.version = 11 : i64} {
  func.func @_addnorm_kernel(%arg0: i32, %arg1: memref<16x128xf32, #tpu.memory_space<vmem>>, %arg2: memref<16x128xf32, #tpu.memory_space<vmem>>, %arg3: memref<1x128xf32, #tpu.memory_space<vmem>>, %arg4: memref<1x128xf32, #tpu.memory_space<vmem>>, %arg5: memref<16x128xf32, #tpu.memory_space<vmem>>) attributes {dimension_semantics = [#tpu.dimension_semantics<parallel>], iteration_bounds = array<i64: 1>, scalar_prefetch = 0 : i64, scratch_operands = 0 : i64, tpu.core_type = #tpu.core_type<tc>, window_params = [{transform_indices = @transform_0, window_bounds = array<i64: 16, 128>}, {transform_indices = @transform_1, window_bounds = array<i64: 16, 128>}, {pipeline_mode = #tpu.pipeline_mode<synchronous>, transform_indices = @transform_2, window_bounds = array<i64: 1, 128>}, {pipeline_mode = #tpu.pipeline_mode<synchronous>, transform_indices = @transform_3, window_bounds = array<i64: 1, 128>}, {transform_indices = @transform_4, window_bounds = array<i64: 16, 128>}]} {
    %c0 = arith.constant 0 : index
    %c0_0 = arith.constant 0 : index
    %0 = vector.load %arg1[%c0, %c0_0] : memref<16x128xf32, #tpu.memory_space<vmem>>, vector<16x128xf32>
    %c0_1 = arith.constant 0 : index
    %c0_2 = arith.constant 0 : index
    %1 = vector.load %arg2[%c0_1, %c0_2] : memref<16x128xf32, #tpu.memory_space<vmem>>, vector<16x128xf32>
    %2 = arith.addf %0, %1 : vector<16x128xf32>
    %cst = arith.constant dense<0.000000e+00> : vector<16xf32>
    %3 = vector.multi_reduction <add>, %2, %cst [1] : vector<16x128xf32> to vector<16xf32>
    %4 = vector.shape_cast %3 : vector<16xf32> to vector<16x1xf32>
    %cst_3 = arith.constant 1.280000e+02 : f32
    %5 = vector.broadcast %cst_3 : f32 to vector<16x1xf32>
    %6 = arith.divf %4, %5 : vector<16x1xf32>
    %7 = vector.broadcast %6 : vector<16x1xf32> to vector<16x128xf32>
    %8 = arith.subf %2, %7 : vector<16x128xf32>
    %9 = arith.mulf %8, %8 : vector<16x128xf32>
    %cst_4 = arith.constant dense<0.000000e+00> : vector<16xf32>
    %10 = vector.multi_reduction <add>, %9, %cst_4 [1] : vector<16x128xf32> to vector<16xf32>
    %11 = vector.shape_cast %10 : vector<16xf32> to vector<16x1xf32>
    %cst_5 = arith.constant 1.280000e+02 : f32
    %12 = vector.broadcast %cst_5 : f32 to vector<16x1xf32>
    %13 = arith.divf %11, %12 : vector<16x1xf32>
    %cst_6 = arith.constant 9.99999974E-6 : f32
    %14 = vector.broadcast %cst_6 : f32 to vector<16x1xf32>
    %15 = arith.addf %13, %14 : vector<16x1xf32>
    %16 = math.rsqrt %15 : vector<16x1xf32>
    %17 = vector.broadcast %16 : vector<16x1xf32> to vector<16x128xf32>
    %18 = arith.mulf %8, %17 : vector<16x128xf32>
    %c0_7 = arith.constant 0 : index
    %c0_8 = arith.constant 0 : index
    %19 = vector.load %arg3[%c0_7, %c0_8] : memref<1x128xf32, #tpu.memory_space<vmem>>, vector<1x128xf32>
    %20 = vector.broadcast %19 : vector<1x128xf32> to vector<16x128xf32>
    %21 = arith.mulf %18, %20 : vector<16x128xf32>
    %c0_9 = arith.constant 0 : index
    %c0_10 = arith.constant 0 : index
    %22 = vector.load %arg4[%c0_9, %c0_10] : memref<1x128xf32, #tpu.memory_space<vmem>>, vector<1x128xf32>
    %23 = vector.broadcast %22 : vector<1x128xf32> to vector<16x128xf32>
    %24 = arith.addf %21, %23 : vector<16x128xf32>
    %c0_11 = arith.constant 0 : index
    %c0_12 = arith.constant 0 : index
    %25 = vector.load %arg5[%c0_11, %c0_12] : memref<16x128xf32, #tpu.memory_space<vmem>>, vector<16x128xf32>
    tpu.vector_store %arg5[%c0_11, %c0_12], %24 {strides = array<i32>} : memref<16x128xf32, #tpu.memory_space<vmem>>, vector<16x128xf32>,
    return
  }
  func.func @transform_0(%arg0: i32) -> (i32, i32) {
    %c0_i32 = arith.constant 0 : i32
    %c0_i32_0 = arith.constant 0 : i32
    return %arg0, %c0_i32 : i32, i32
  }
  func.func @transform_1(%arg0: i32) -> (i32, i32) {
    %c0_i32 = arith.constant 0 : i32
    %c0_i32_0 = arith.constant 0 : i32
    return %arg0, %c0_i32 : i32, i32
  }
  func.func @transform_2(%arg0: i32) -> (i32, i32) {
    %c0_i32 = arith.constant 0 : i32
    %c0_i32_0 = arith.constant 0 : i32
    %c0_i32_1 = arith.constant 0 : i32
    return %c0_i32, %c0_i32_0 : i32, i32
  }
  func.func @transform_3(%arg0: i32) -> (i32, i32) {
    %c0_i32 = arith.constant 0 : i32
    %c0_i32_0 = arith.constant 0 : i32
    %c0_i32_1 = arith.constant 0 : i32
    return %c0_i32, %c0_i32_0 : i32, i32
  }
  func.func @transform_4(%arg0: i32) -> (i32, i32) {
    %c0_i32 = arith.constant 0 : i32
    %c0_i32_0 = arith.constant 0 : i32
    return %arg0, %c0_i32 : i32, i32
  }
}

</mosaic_0001>

<bundles_post_ra>
// kernel: tpu_custom_call.1
= control target key start
LH: loop header
LB: loop body
LE: loop exit
PB: predicated region body
PF: predicated region fallthrough
CT: control target
= control target key end

     0   :  { %9 = vsyncpa [#allocation3], 0  ;;  %s244_s0 = inlined_call_operand.hbm [shape: f32[16,128], index: 0, kind: input, shape index: {}]   ;;  %s245_s1 = inlined_call_operand.hbm [shape: f32[16,128], index: 1, kind: input, shape index: {}]   ;;  %s246_s2 = inlined_call_operand.vmem [shape: f32[1,128], index: 2, kind: input, shape index: {}]   ;;  %s247_s3 = inlined_call_operand.vmem [shape: f32[1,128], index: 3, kind: input, shape index: {}]   ;;  %s248_s4 = inlined_call_operand.hbm [shape: f32[16,128], index: 4, kind: output, shape index: {}]  }
   0x1   :  { %10 = vsyncpa [#allocation6], 0 }
   0x2   :  { %11 = vsyncpa [#allocation4], 0  ;;  %s190_s15 = smov [#allocation2]  }
   0x3   :  { %s17_s16 = sshll.u32 %s190_s15, 4  ;;  %s18_s16 = int_to_ptr.vmem [resolvable:$true] %s17_s16 }
   0x4   :  { %s132_s17 = scalar_lea.vmem %s18_s16, 256  ;;  %p137_p1 = scmp.lt.s32.totalorder %s18_s16, %s18_s16 }
   0x5   :  { %p133_p0 = scmp.ne.s32.totalorder %s18_s16, %s132_s17  ;;  %p138_p2 = scmp.lt.s32.totalorder %s132_s17, %s132_s17 }
   0x7   :  { %p139_p3 = por %p138_p2, %p137_p1 }
   0x9   :  { %p140_p4 = pnand %p139_p3, %p133_p0 }
   0xb   :  { %143 = shalt.err (!%p140_p4)
}
   0xc   :  { %s191_s18 = smov 128   ;;  %s192_s19 = smov 8  }
   0xd   :  { %23 = dma.hbm_to_vmem [thread:$0]  %s244_s0, 256, %s18_s16, [#allocation3], %s191_s18, %s191_s18, %s192_s19  }
   0xe   :  { %s193_s22 = smov [#allocation5]  }
   0xf   :  { %s29_s23 = sshll.u32 %s193_s22, 4  ;;  %s30_s23 = int_to_ptr.vmem [resolvable:$true] %s29_s23 }
  0x10   :  { %s152_s24 = scalar_lea.vmem %s30_s23, 256  ;;  %p157_p6 = scmp.lt.s32.totalorder %s30_s23, %s30_s23 }
  0x11   :  { %p153_p5 = scmp.ne.s32.totalorder %s30_s23, %s152_s24  ;;  %p158_p7 = scmp.lt.s32.totalorder %s152_s24, %s152_s24 }
  0x13   :  { %p159_p8 = por %p158_p7, %p157_p6 }
  0x15   :  { %p160_p9 = pnand %p159_p8, %p153_p5 }
  0x17   :  { %163 = shalt.err (!%p160_p9)
}
  0x18   :  { %35 = dma.hbm_to_vmem [thread:$0]  %s245_s1, 256, %s30_s23, [#allocation6], %s191_s18, %s191_s18, %s192_s19  }
  0x19   :  { %184 = dma.done.wait [#allocation3], 256  }
  0x1a   :  { %185 = vsyncadd [#allocation3], 4294967040 }
  0x1b   :  { %186 = dma.done.wait [#allocation6], 256  }
  0x1c   :  { %187 = vsyncadd [#allocation6], 4294967040  ;;  %v46_v0 = vld [vmem:[#allocation2] sm:$0xff]  ;;  %v48_v1 = vld [vmem:[#allocation5] sm:$0xff]  ;;  %s194_s29 = smov [#allocation7]  }
  0x1d   :  { %v47_v2 = vld [vmem:[#allocation2 + $0x8] sm:$0xff]  ;;  %v50_v3 = vadd.f32 %v48_v1, %v46_v0  ;;  %v49_v4 = vld [vmem:[#allocation5 + $0x8] sm:$0xff]  ;;  %v113_v21 = vld [vmem:[%s246_s2] ss:$0 sm:$0xff]  ;;  %s100_s30 = sshll.u32 %s194_s29, 4  ;;  %s101_s30 = int_to_ptr.vmem [resolvable:$true] %s100_s30 }
  0x1e   :  { %v51_v5 = vadd.f32 %v49_v4, %v47_v2  ;;  %v114_v23 = vld [vmem:[%s247_s3] ss:$0 sm:$0xff]  ;;  %s164_s5 = scalar_lea.vmem %s101_s30, 256  ;;  %p169_p11 = scmp.lt.s32.totalorder %s101_s30, %s101_s30 }
  0x1f   :  { %52 = vadd.xlane.f32.xlu0 %v50_v3  ;;  %p165_p10 = scmp.ne.s32.totalorder %s101_s30, %s164_s5  ;;  %p170_p12 = scmp.lt.s32.totalorder %s164_s5, %s164_s5 }
  0x21   :  { %p171_p13 = por %p170_p12, %p169_p11 }
  0x23   :  { %54 = vadd.xlane.f32.xlu0 %v51_v5  ;;  %p172_p0 = pnand %p171_p13, %p165_p10 }
  0xa8   :  { %v53_v6 = vpop.xlane.xlu0 %52 }
  0xa9   :  { %v57_v7 = vmul.f32 0.0078125, %v53_v6 }
  0xab   :  { %v59_v8 = vsub.f32 %v50_v3, %v57_v7 }
  0xac   :  { %v55_v9 = vpop.xlane.xlu0 %54 }
  0xad   :  { %v58_v10 = vmul.f32 0.0078125, %v55_v9  ;;  %v61_v11 = vmul.f32 %v59_v8, %v59_v8 }
  0xaf   :  { %v60_v12 = vsub.f32 %v51_v5, %v58_v10  ;;  %63 = vadd.xlane.f32.xlu1 %v61_v11 }
  0xb1   :  { %v62_v13 = vmul.f32 %v60_v12, %v60_v12 }
  0xb3   :  { %65 = vadd.xlane.f32.xlu1 %v62_v13 }
 0x138   :  { %v64_v14 = vpop.xlane.xlu1 %63 }
 0x139   :  { %v67_v15 = vmul.f32 0.0078125, %v64_v14 }
 0x13b   :  { %v69_v16 = vadd.f32 1e-05, %v67_v15 }
 0x13c   :  { %v66_v17 = vpop.xlane.xlu1 %65 }
 0x13d   :  { %120 = vrsqrt.f32 %v69_v16  ;;  %v68_v18 = vmul.f32 0.0078125, %v66_v17 }
 0x13f   :  { %v70_v19 = vadd.f32 1e-05, %v68_v18 }
 0x141   :  { %122 = vrsqrt.f32 %v70_v19 }
 0x14a   :  { %v121_v20 = vpop.eup %120 }
 0x14b   :  { %v73_v22 = vmul.f32 %v121_v20, %v59_v8 }
 0x14d   :  { %v82_v24 = vmul.f32 %v113_v21, %v73_v22 }
 0x14e   :  { %v123_v25 = vpop.eup %122 }
 0x14f   :  { %v74_v26 = vmul.f32 %v123_v25, %v60_v12  ;;  %v91_v27 = vadd.f32 %v114_v23, %v82_v24 }
 0x151   :  { %v83_v28 = vmul.f32 %v113_v21, %v74_v26  ;;  %93 = vst [vmem:[#allocation7] sm:$0xff] %v91_v27 }
 0x153   :  { %v92_v29 = vadd.f32 %v114_v23, %v83_v28 }
 0x155   :  { %94 = vst [vmem:[#allocation7 + $0x8] sm:$0xff] %v92_v29 }
 0x156   :  { %175 = shalt.err (!%p172_p0)
}
 0x157   :  { %106 = dma.vmem_to_hbm [thread:$0]  %s101_s30, 256, %s248_s4, [#allocation4], %s191_s18, %s191_s18, %s192_s19  }
 0x158   :  { %188 = dma.done.wait [#allocation4], 256  }
 0x159   :  { %189 = vsyncadd [#allocation4], 4294967040 }
 0x15a   :  { %110 = vsyncpa [#allocation3], 1 }
 0x15b   :  { %111 = vsyncpa [#allocation6], 1 }
 0x15c   :  { %112 = vsyncpa [#allocation4], 1 }

</bundles_post_ra>
